<compile_context>
chip_gen: v7x
topology: tpu7x:2x2x1
jax: 0.10.0
libtpu: 0.0.40
codegen_flags: <defaults>
</compile_context>

<pallas_src>
import functools

import jax
import jax.numpy as jnp
from jax.experimental import pallas as pl
from jax.experimental.pallas import tpu as pltpu


# ---------------------------------------------------------------------------
# Kernel A: attention + trans_conv (pre-BN) + fused BN statistics.
#   grid = (B, N // tile_q); axis 1 is the streamed (query) axis.
#   Scratch (persists across the query-tile axis, re-initialized at qt == 0):
#     k_s    (N, Cq) -- key projection of the full slab
#     s_acc  (N, C)  -- running  sum_n P[m, n] * v[n, :]
#     cs_acc (N, 1)  -- running  sum_n P[m, n]   (attention column sum)
#   At the last tile: x_r = s_acc / (1e-6 + cs_acc); pre = (x - x_r) @ Wt + bt
#   plus per-batch (1, C) sum / sumsq of `pre` for BatchNorm.
# ---------------------------------------------------------------------------
def sa_attn_kernel(x_ref, wq_ref, wk_ref, wv_ref, bv_ref, wt_ref, bt_ref,
                   o_ref, bsum_ref, bsq_ref, k_s, s_acc, cs_acc,
                   *, tile_q, use_bf16):
    qt = pl.program_id(1)
    num_qt = pl.num_programs(1)
    mx = (lambda a: a.astype(jnp.bfloat16)) if use_bf16 else (lambda a: a)
    approx = use_bf16  # approx reciprocal only on the relaxed-accuracy path

    @pl.when(qt == 0)
    def _():
        x = x_ref[0]                                                  # (N, C)
        # Only the key projection must stay resident; q / v are per-tile.
        k_s[...] = jnp.dot(mx(x), mx(wk_ref[...]),
                           preferred_element_type=jnp.float32).astype(k_s.dtype)
        s_acc[...] = jnp.zeros_like(s_acc)
        cs_acc[...] = jnp.zeros_like(cs_acc)

    row0 = pl.multiple_of(qt * tile_q, tile_q)
    x_blk = x_ref[0, pl.ds(row0, tile_q), :]                          # (tq, C)
    q_blk = jnp.dot(mx(x_blk), mx(wq_ref[...]),
                    preferred_element_type=jnp.float32)               # (tq, Cq)
    v_blk = (jnp.dot(mx(x_blk), mx(wv_ref[...]),
                     preferred_element_type=jnp.float32)
             + bv_ref[...])                                           # (tq, C)

    # p[m, n] = <k_m, q_n> == energy[n, m]; NT matmul (contract last dims).
    p = jax.lax.dot_general(k_s[...], mx(q_blk), (((1,), (1,)), ((), ())),
                            preferred_element_type=jnp.float32)       # (N, tq)
    # torch softmax(energy, dim=-1) == per-query softmax over keys (axis 0).
    p = jnp.exp(p - jnp.max(p, axis=0, keepdims=True))
    p = p * pl.reciprocal(jnp.sum(p, axis=0, keepdims=True), approx=approx)
    # Accumulate the attention column sum (over queries) and S = P @ v.
    cs_acc[...] += jnp.sum(p, axis=1, keepdims=True)                  # (N, 1)
    s_acc[...] += jnp.dot(mx(p), mx(v_blk),
                          preferred_element_type=jnp.float32)         # (N, C)

    @pl.when(qt == num_qt - 1)
    def _():
        x = x_ref[0]                                                  # (N, C)
        x_r = s_acc[...] * pl.reciprocal(1e-6 + cs_acc[...], approx=approx)
        pre = (jnp.dot(mx(x - x_r), mx(wt_ref[...]),
                       preferred_element_type=jnp.float32)
               + bt_ref[...])
        o_ref[0] = pre.astype(o_ref.dtype)
        # Fused BatchNorm batch statistics (per-batch partials; the tiny
        # B-axis reduction is finished in XLA by the wrapper).
        bsum_ref[0] = jnp.sum(pre, axis=0, keepdims=True)
        bsq_ref[0] = jnp.sum(pre * pre, axis=0, keepdims=True)


# ---------------------------------------------------------------------------
# Kernel B: normalize (training-mode batch stats) + affine + ReLU + residual.
# Fully parallel over row tiles; output aliases the dead pre-BN input.
# ---------------------------------------------------------------------------
def bn_apply_kernel(sum_ref, sq_ref, t_ref, x_ref, gamma_ref, beta_ref, o_ref,
                    *, inv_count):
    mean = sum_ref[...] * inv_count                                   # (1, C)
    # One-pass (biased) variance, clamped at 0.
    # TODO(synk): two-pass / Welford variance if R grows enough for
    # E[x^2] - mean^2 cancellation to matter at f32.
    var = jnp.maximum(sq_ref[...] * inv_count - mean * mean, 0.0)
    rstd = jax.lax.rsqrt(var + 1e-5)
    y = (t_ref[...] - mean) * (rstd * gamma_ref[...]) + beta_ref[...]
    o_ref[...] = x_ref[...] + jnp.maximum(y, 0.0)


# ---------------------------------------------------------------------------
# Tile / VMEM-budget helpers.
# ---------------------------------------------------------------------------
def _largest_divisor(total, cap, align):
    for d in range(min(total, cap), 0, -1):
        if total % d == 0 and d % align == 0:
            return d
    return None


def _pick_q_tile(n, cap=256):
    # Prefer MXU-depth multiples (256, then 128) so the P@V contraction depth
    # fills the MXU; fall back to sublane-aligned divisors, else one full tile.
    for align in (256, 128, 8):
        d = _largest_divisor(n, cap, align)
        if d is not None:
            return d
    return n


def _pick_row_tile(r, c):
    cap = 2048 if c <= 128 else 1024      # keep streamed blocks >= ~512 KB
    d = _largest_divisor(r, cap, 8)
    return d if d is not None else r


def _attn_vmem_limit_bytes(n, c, cq, tile_q):
    f, lane = 4, 128
    need = (
        4 * n * c * f                                   # x + out blocks (2x buffered)
        + n * max(cq, lane) * f                         # k_s (lane-padded)
        + n * c * f                                     # s_acc
        + n * lane * f                                  # cs_acc (N,1) lane-padded
        + 2 * n * max(tile_q, lane) * f                 # p transient (+ headroom)
        + 3 * tile_q * max(c, lane) * f                 # x_blk / q_blk / v_blk
        + 2 * (2 * c * max(cq, lane) + 2 * c * c + 4 * lane) * f   # weights/bias
        + 8 * c * f                                     # per-batch BN partials
    )
    need = int(need * 1.25) + (2 << 20)
    try:
        phys = int(getattr(pltpu.get_tpu_info(), "vmem_capacity_bytes", 0)) or (64 << 20)
    except Exception:
        phys = 64 << 20                                 # conservative (v7x per-TC)
    cap = int(phys * 0.9)
    return max(min(need, cap), min(32 << 20, cap))


# ---------------------------------------------------------------------------
# Wrapper
# ---------------------------------------------------------------------------
@functools.partial(jax.jit,
                   static_argnames=("tile_q", "row_tile", "use_bf16_matmul"))
def sa_layer_single_head(x, wq, wk, wv, bv, wt, bt, gamma, beta,
                         *, tile_q=None, row_tile=None, use_bf16_matmul=False):
    B, N, C = x.shape
    Cq = wq.shape[0]                                    # C // 4
    R = B * N

    if tile_q is None:
        tile_q = _pick_q_tile(N)
    if row_tile is None:
        row_tile = _pick_row_tile(R, C)
    assert N % tile_q == 0, (N, tile_q)
    assert tile_q == N or tile_q % 8 == 0, tile_q
    assert R % row_tile == 0, (R, row_tile)
    # TODO(synk): v7x megacore — split the query axis across the 2 TensorCores
    # when B is 1/odd; with B >= 2 the "parallel" batch axis already shards.

    # Pre-transpose the 1x1-conv weights once in XLA: (out, in) -> (in, out).
    wq_t, wk_t, wv_t, wt_t = wq.T, wk.T, wv.T, wt.T
    bv2, bt2 = bv.reshape(1, C), bt.reshape(1, C)
    gamma2, beta2 = gamma.reshape(1, C), beta.reshape(1, C)

    k_dtype = jnp.bfloat16 if use_bf16_matmul else jnp.float32
    vmem_limit = _attn_vmem_limit_bytes(N, C, Cq, tile_q)
    # TODO(synk): key-tiled online-softmax fallback when the ~20*N*C-byte
    # resident set exceeds the v7x 64 MiB VMEM budget.

    # --- Kernel A: attention + trans_conv (pre-BN) + fused BN statistics. ---
    t_pre, bsum, bsq = pl.pallas_call(
        functools.partial(sa_attn_kernel, tile_q=tile_q,
                          use_bf16=use_bf16_matmul),
        out_shape=(jax.ShapeDtypeStruct((B, N, C), jnp.float32),
                   jax.ShapeDtypeStruct((B, 1, C), jnp.float32),
                   jax.ShapeDtypeStruct((B, 1, C), jnp.float32)),
        grid=(B, N // tile_q),
        in_specs=[
            pl.BlockSpec((1, N, C), lambda b, t: (b, 0, 0)),   # x (resident)
            pl.BlockSpec((C, Cq), lambda b, t: (0, 0)),        # wq^T
            pl.BlockSpec((C, Cq), lambda b, t: (0, 0)),        # wk^T
            pl.BlockSpec((C, C), lambda b, t: (0, 0)),         # wv^T
            pl.BlockSpec((1, C), lambda b, t: (0, 0)),         # bv
            pl.BlockSpec((C, C), lambda b, t: (0, 0)),         # wt^T
            pl.BlockSpec((1, C), lambda b, t: (0, 0)),         # bt
        ],
        out_specs=(
            pl.BlockSpec((1, N, C), lambda b, t: (b, 0, 0)),   # pre-BN
            pl.BlockSpec((1, 1, C), lambda b, t: (b, 0, 0)),   # BN sum
            pl.BlockSpec((1, 1, C), lambda b, t: (b, 0, 0)),   # BN sumsq
        ),
        scratch_shapes=[
            pltpu.VMEM((N, Cq), k_dtype),       # k projection (resident)
            pltpu.VMEM((N, C), jnp.float32),    # S accumulator
            pltpu.VMEM((N, 1), jnp.float32),    # attention column-sum acc
        ],
        compiler_params=pltpu.CompilerParams(
            dimension_semantics=("parallel", "arbitrary"),
            vmem_limit_bytes=vmem_limit),
    )(x, wq_t, wk_t, wv_t, bv2, wt_t, bt2)

    # Finish the (tiny) batch reduction of the BN statistics in XLA.
    sum_ = jnp.sum(bsum, axis=0)                                     # (1, C)
    sq_ = jnp.sum(bsq, axis=0)                                       # (1, C)

    t2 = t_pre.reshape(R, C)
    x2 = x.reshape(R, C)

    # --- Kernel B: normalize + affine + ReLU + residual (pipelined). ---
    out2 = pl.pallas_call(
        functools.partial(bn_apply_kernel, inv_count=1.0 / float(R)),
        out_shape=jax.ShapeDtypeStruct((R, C), jnp.float32),
        grid=(R // row_tile,),
        in_specs=[
            pl.BlockSpec((1, C), lambda i: (0, 0)),            # sum
            pl.BlockSpec((1, C), lambda i: (0, 0)),            # sumsq
            pl.BlockSpec((row_tile, C), lambda i: (i, 0)),     # t (pre-BN)
            pl.BlockSpec((row_tile, C), lambda i: (i, 0)),     # x (residual)
            pl.BlockSpec((1, C), lambda i: (0, 0)),            # gamma
            pl.BlockSpec((1, C), lambda i: (0, 0)),            # beta
        ],
        out_specs=pl.BlockSpec((row_tile, C), lambda i: (i, 0)),
        input_output_aliases={2: 0},                           # reuse t's HBM
        compiler_params=pltpu.CompilerParams(
            dimension_semantics=("parallel",)),
    )(sum_, sq_, t2, x2, gamma2, beta2)

    return out2.reshape(B, N, C)


# ---------------------------------------------------------------------------
# Pure-JAX reference (mirrors the PyTorch forward exactly, NCW internally).
# ---------------------------------------------------------------------------
def ref_forward(x, wq, wk, wv, bv, wt, bt, gamma, beta):
    P = jax.lax.Precision.HIGHEST
    xp = jnp.transpose(x, (0, 2, 1))                                  # (B, C, N)
    xq = jnp.einsum("oc,bcn->bon", wq, xp, precision=P)               # (B, C/4, N)
    xq = jnp.transpose(xq, (0, 2, 1))                                 # (B, N, C/4)
    xk = jnp.einsum("oc,bcn->bon", wk, xp, precision=P)               # (B, C/4, N)
    xv = jnp.einsum("oc,bcn->bon", wv, xp, precision=P) + bv[None, :, None]
    energy = jnp.einsum("bnc,bcm->bnm", xq, xk, precision=P)          # (B, N, N)
    att = jax.nn.softmax(energy, axis=-1)
    att = att / (1e-6 + jnp.sum(att, axis=1, keepdims=True))
    x_r = jnp.einsum("bcn,bnm->bcm", xv, att, precision=P)            # (B, C, N)
    t = jnp.einsum("oc,bcn->bon", wt, xp - x_r, precision=P) + bt[None, :, None]
    mean = jnp.mean(t, axis=(0, 2), keepdims=True)
    var = jnp.mean(jnp.square(t - mean), axis=(0, 2), keepdims=True)  # biased (training BN)
    y = (t - mean) / jnp.sqrt(var + 1e-5)
    y = y * gamma[None, :, None] + beta[None, :, None]
    y = jnp.maximum(y, 0.0)
    out = xp + y
    return jnp.transpose(out, (0, 2, 1))                              # (B, N, C)


if __name__ == "__main__":
    B, N, C = 2, 16, 32
    Cq = C // 4

    key = jax.random.PRNGKey(0)
    kx, kq, kk, kv, kbv, kt, kbt = jax.random.split(key, 7)

    x = jax.random.normal(kx, (B, N, C), dtype=jnp.float32)

    # Deterministic synthetic parameters (shapes from the module's __init__).
    scale = 1.0 / jnp.sqrt(jnp.float32(C))
    wq = jax.random.normal(kq, (Cq, C), dtype=jnp.float32) * scale    # q_conv (no bias)
    wk = jax.random.normal(kk, (Cq, C), dtype=jnp.float32) * scale    # k_conv (no bias)
    wv = jax.random.normal(kv, (C, C), dtype=jnp.float32) * scale     # v_conv weight
    bv = jax.random.normal(kbv, (C,), dtype=jnp.float32) * 0.1        # v_conv bias
    wt = jax.random.normal(kt, (C, C), dtype=jnp.float32) * scale     # trans_conv weight
    bt = jax.random.normal(kbt, (C,), dtype=jnp.float32) * 0.1        # trans_conv bias
    gamma = jnp.ones((C,), dtype=jnp.float32)                          # BN weight init
    beta = jnp.zeros((C,), dtype=jnp.float32)                          # BN bias init

    # Small tiles chosen on purpose so the query-tile and row-tile streaming
    # (multi-step accumulation) is actually exercised at this tiny test size.
    out = sa_layer_single_head(x, wq, wk, wv, bv, wt, bt, gamma, beta,
                               tile_q=8, row_tile=8)
    out = jax.block_until_ready(out)

    ref = ref_forward(x, wq, wk, wv, bv, wt, bt, gamma, beta)
    assert out.shape == (B, N, C)
    max_err = float(jnp.max(jnp.abs(out - ref)))
    # Slightly looser than 1e-4 purely for accumulation-order differences
    # (query-tile-split sums); still f32-level agreement.
    assert jnp.allclose(out, ref, atol=2e-4, rtol=2e-4), f"max abs err = {max_err}"
    print("KERNEL_OK")
</pallas_src>

<mosaic_0001>
module attributes {stable_mosaic.version = 11 : i64} {
  func.func @sa_attn_kernel(%arg0: i32, %arg1: i32, %arg2: memref<1x16x32xf32, #tpu.memory_space<vmem>>, %arg3: memref<32x8xf32, #tpu.memory_space<vmem>>, %arg4: memref<32x8xf32, #tpu.memory_space<vmem>>, %arg5: memref<32x32xf32, #tpu.memory_space<vmem>>, %arg6: memref<1x32xf32, #tpu.memory_space<vmem>>, %arg7: memref<32x32xf32, #tpu.memory_space<vmem>>, %arg8: memref<1x32xf32, #tpu.memory_space<vmem>>, %arg9: memref<1x16x32xf32, #tpu.memory_space<vmem>>, %arg10: memref<1x1x32xf32, #tpu.memory_space<vmem>>, %arg11: memref<1x1x32xf32, #tpu.memory_space<vmem>>, %arg12: memref<16x8xf32, #tpu.memory_space<vmem>>, %arg13: memref<16x32xf32, #tpu.memory_space<vmem>>, %arg14: memref<16x1xf32, #tpu.memory_space<vmem>>) attributes {dimension_semantics = [#tpu.dimension_semantics<parallel>, #tpu.dimension_semantics<arbitrary>], iteration_bounds = array<i64: 2, 2>, scalar_prefetch = 0 : i64, scratch_operands = 3 : i64, tpu.core_type = #tpu.core_type<tc>, window_params = [{transform_indices = @transform_0, window_bounds = array<i64: 1, 16, 32>}, {pipeline_mode = #tpu.pipeline_mode<synchronous>, transform_indices = @transform_1, window_bounds = array<i64: 32, 8>}, {pipeline_mode = #tpu.pipeline_mode<synchronous>, transform_indices = @transform_2, window_bounds = array<i64: 32, 8>}, {pipeline_mode = #tpu.pipeline_mode<synchronous>, transform_indices = @transform_3, window_bounds = array<i64: 32, 32>}, {pipeline_mode = #tpu.pipeline_mode<synchronous>, transform_indices = @transform_4, window_bounds = array<i64: 1, 32>}, {pipeline_mode = #tpu.pipeline_mode<synchronous>, transform_indices = @transform_5, window_bounds = array<i64: 32, 32>}, {pipeline_mode = #tpu.pipeline_mode<synchronous>, transform_indices = @transform_6, window_bounds = array<i64: 1, 32>}, {transform_indices = @transform_7, window_bounds = array<i64: 1, 16, 32>}, {transform_indices = @transform_8, window_bounds = array<i64: 1, 1, 32>}, {transform_indices = @transform_9, window_bounds = array<i64: 1, 1, 32>}]} {
    %c0_i32 = arith.constant 0 : i32
    %0 = arith.cmpi eq, %arg1, %c0_i32 : i32
    %1 = arith.extui %0 : i1 to i32
    %c0_i32_0 = arith.constant 0 : i32
    %2 = arith.cmpi ne, %1, %c0_i32_0 : i32
    scf.if %2 {
      %c0_25 = arith.constant 0 : index
      %c0_26 = arith.constant 0 : index
      %c0_27 = arith.constant 0 : index
      %39 = vector.load %arg2[%c0_25, %c0_26, %c0_27] : memref<1x16x32xf32, #tpu.memory_space<vmem>>, vector<1x16x32xf32>
      %40 = vector.shape_cast %39 : vector<1x16x32xf32> to vector<16x32xf32>
      %c0_28 = arith.constant 0 : index
      %c0_29 = arith.constant 0 : index
      %41 = vector.load %arg4[%c0_28, %c0_29] : memref<32x8xf32, #tpu.memory_space<vmem>>, vector<32x8xf32>
      %cst_30 = arith.constant dense<0.000000e+00> : vector<16x8xf32>
      %42 = tpu.matmul %40, %41, %cst_30 {dimension_numbers = #tpu.dot_dimension_numbers<[1], [0], [0], [1], [0, 0, 1, 1], [], []>} : vector<16x32xf32>, vector<32x8xf32>, vector<16x8xf32> -> vector<16x8xf32>
      %c0_31 = arith.constant 0 : index
      %c0_32 = arith.constant 0 : index
      %43 = vector.load %arg12[%c0_31, %c0_32] : memref<16x8xf32, #tpu.memory_space<vmem>>, vector<16x8xf32>
      tpu.vector_store %arg12[%c0_31, %c0_32], %42 {strides = array<i32>} : memref<16x8xf32, #tpu.memory_space<vmem>>, vector<16x8xf32>,
      %cst_33 = arith.constant 0.000000e+00 : f32
      %44 = vector.broadcast %cst_33 : f32 to vector<16x32xf32>
      %c0_34 = arith.constant 0 : index
      %c0_35 = arith.constant 0 : index
      %45 = vector.load %arg13[%c0_34, %c0_35] : memref<16x32xf32, #tpu.memory_space<vmem>>, vector<16x32xf32>
      tpu.vector_store %arg13[%c0_34, %c0_35], %44 {strides = array<i32>} : memref<16x32xf32, #tpu.memory_space<vmem>>, vector<16x32xf32>,
      %cst_36 = arith.constant 0.000000e+00 : f32
      %46 = vector.broadcast %cst_36 : f32 to vector<16x1xf32>
      %c0_37 = arith.constant 0 : index
      %c0_38 = arith.constant 0 : index
      %47 = vector.load %arg14[%c0_37, %c0_38] : memref<16x1xf32, #tpu.memory_space<vmem>>, vector<16x1xf32>
      tpu.vector_store %arg14[%c0_37, %c0_38], %46 {strides = array<i32>} : memref<16x1xf32, #tpu.memory_space<vmem>>, vector<16x1xf32>,
    } else {
    }
    %c8_i32 = arith.constant 8 : i32
    %3 = arith.muli %arg1, %c8_i32 : i32
    %4 = tpu.assume_multiple %3, 8 : i32
    %c0 = arith.constant 0 : index
    %5 = arith.index_cast %4 : i32 to index
    %c0_1 = arith.constant 0 : index
    %6 = vector.load %arg2[%c0, %5, %c0_1] : memref<1x16x32xf32, #tpu.memory_space<vmem>>, vector<1x8x32xf32>
    %7 = vector.shape_cast %6 : vector<1x8x32xf32> to vector<8x32xf32>
    %c0_2 = arith.constant 0 : index
    %c0_3 = arith.constant 0 : index
    %8 = vector.load %arg3[%c0_2, %c0_3] : memref<32x8xf32, #tpu.memory_space<vmem>>, vector<32x8xf32>
    %cst = arith.constant dense<0.000000e+00> : vector<8x8xf32>
    %9 = tpu.matmul %7, %8, %cst {dimension_numbers = #tpu.dot_dimension_numbers<[1], [0], [0], [1], [0, 0, 1, 1], [], []>} : vector<8x32xf32>, vector<32x8xf32>, vector<8x8xf32> -> vector<8x8xf32>
    %c0_4 = arith.constant 0 : index
    %c0_5 = arith.constant 0 : index
    %10 = vector.load %arg5[%c0_4, %c0_5] : memref<32x32xf32, #tpu.memory_space<vmem>>, vector<32x32xf32>
    %cst_6 = arith.constant dense<0.000000e+00> : vector<8x32xf32>
    %11 = tpu.matmul %7, %10, %cst_6 {dimension_numbers = #tpu.dot_dimension_numbers<[1], [0], [0], [1], [0, 0, 1, 1], [], []>} : vector<8x32xf32>, vector<32x32xf32>, vector<8x32xf32> -> vector<8x32xf32>
    %c0_7 = arith.constant 0 : index
    %c0_8 = arith.constant 0 : index
    %12 = vector.load %arg6[%c0_7, %c0_8] : memref<1x32xf32, #tpu.memory_space<vmem>>, vector<1x32xf32>
    %13 = vector.broadcast %12 : vector<1x32xf32> to vector<8x32xf32>
    %14 = arith.addf %11, %13 : vector<8x32xf32>
    %c0_9 = arith.constant 0 : index
    %c0_10 = arith.constant 0 : index
    %15 = vector.load %arg12[%c0_9, %c0_10] : memref<16x8xf32, #tpu.memory_space<vmem>>, vector<16x8xf32>
    %cst_11 = arith.constant dense<0.000000e+00> : vector<16x8xf32>
    %16 = tpu.matmul %15, %9, %cst_11 {dimension_numbers = #tpu.dot_dimension_numbers<[1], [1], [0], [0], [0, 0, 1, 0], [], []>} : vector<16x8xf32>, vector<8x8xf32>, vector<16x8xf32> -> vector<16x8xf32>
    %cst_12 = arith.constant dense<0xFF800000> : vector<8xf32>
    %17 = vector.multi_reduction <maximumf>, %16, %cst_12 [0] : vector<16x8xf32> to vector<8xf32>
    %18 = vector.shape_cast %17 : vector<8xf32> to vector<1x8xf32>
    %19 = vector.broadcast %18 : vector<1x8xf32> to vector<16x8xf32>
    %20 = arith.subf %16, %19 : vector<16x8xf32>
    %21 = math.exp %20 : vector<16x8xf32>
    %cst_13 = arith.constant dense<0.000000e+00> : vector<8xf32>
    %22 = vector.multi_reduction <add>, %21, %cst_13 [0] : vector<16x8xf32> to vector<8xf32>
    %23 = vector.shape_cast %22 : vector<8xf32> to vector<1x8xf32>
    %24 = tpu.reciprocal %23 : vector<1x8xf32> -> vector<1x8xf32>
    %25 = vector.broadcast %24 : vector<1x8xf32> to vector<16x8xf32>
    %26 = arith.mulf %21, %25 : vector<16x8xf32>
    %c0_14 = arith.constant 0 : index
    %c0_15 = arith.constant 0 : index
    %27 = vector.load %arg14[%c0_14, %c0_15] : memref<16x1xf32, #tpu.memory_space<vmem>>, vector<16x1xf32>
    %cst_16 = arith.constant dense<0.000000e+00> : vector<16xf32>
    %28 = vector.multi_reduction <add>, %26, %cst_16 [1] : vector<16x8xf32> to vector<16xf32>
    %29 = vector.shape_cast %28 : vector<16xf32> to vector<16x1xf32>
    %30 = arith.addf %27, %29 : vector<16x1xf32>
    %c0_17 = arith.constant 0 : index
    %c0_18 = arith.constant 0 : index
    %31 = vector.load %arg14[%c0_17, %c0_18] : memref<16x1xf32, #tpu.memory_space<vmem>>, vector<16x1xf32>
    tpu.vector_store %arg14[%c0_17, %c0_18], %30 {strides = array<i32>} : memref<16x1xf32, #tpu.memory_space<vmem>>, vector<16x1xf32>,
    %c0_19 = arith.constant 0 : index
    %c0_20 = arith.constant 0 : index
    %32 = vector.load %arg13[%c0_19, %c0_20] : memref<16x32xf32, #tpu.memory_space<vmem>>, vector<16x32xf32>
    %cst_21 = arith.constant dense<0.000000e+00> : vector<16x32xf32>
    %33 = tpu.matmul %26, %14, %cst_21 {dimension_numbers = #tpu.dot_dimension_numbers<[1], [0], [0], [1], [0, 0, 1, 1], [], []>} : vector<16x8xf32>, vector<8x32xf32>, vector<16x32xf32> -> vector<16x32xf32>
    %34 = arith.addf %32, %33 : vector<16x32xf32>
    %c0_22 = arith.constant 0 : index
    %c0_23 = arith.constant 0 : index
    %35 = vector.load %arg13[%c0_22, %c0_23] : memref<16x32xf32, #tpu.memory_space<vmem>>, vector<16x32xf32>
    tpu.vector_store %arg13[%c0_22, %c0_23], %34 {strides = array<i32>} : memref<16x32xf32, #tpu.memory_space<vmem>>, vector<16x32xf32>,
    %c1_i32 = arith.constant 1 : i32
    %36 = arith.cmpi eq, %arg1, %c1_i32 : i32
    %37 = arith.extui %36 : i1 to i32
    %c0_i32_24 = arith.constant 0 : i32
    %38 = arith.cmpi ne, %37, %c0_i32_24 : i32
    scf.if %38 {
      %c0_25 = arith.constant 0 : index
      %c0_26 = arith.constant 0 : index
      %c0_27 = arith.constant 0 : index
      %39 = vector.load %arg2[%c0_25, %c0_26, %c0_27] : memref<1x16x32xf32, #tpu.memory_space<vmem>>, vector<1x16x32xf32>
      %40 = vector.shape_cast %39 : vector<1x16x32xf32> to vector<16x32xf32>
      %c0_28 = arith.constant 0 : index
      %c0_29 = arith.constant 0 : index
      %41 = vector.load %arg13[%c0_28, %c0_29] : memref<16x32xf32, #tpu.memory_space<vmem>>, vector<16x32xf32>
      %c0_30 = arith.constant 0 : index
      %c0_31 = arith.constant 0 : index
      %42 = vector.load %arg14[%c0_30, %c0_31] : memref<16x1xf32, #tpu.memory_space<vmem>>, vector<16x1xf32>
      %cst_32 = arith.constant 9.99999997E-7 : f32
      %43 = vector.broadcast %cst_32 : f32 to vector<16x1xf32>
      %44 = arith.addf %43, %42 : vector<16x1xf32>
      %45 = tpu.reciprocal %44 : vector<16x1xf32> -> vector<16x1xf32>
      %46 = vector.broadcast %45 : vector<16x1xf32> to vector<16x32xf32>
      %47 = arith.mulf %41, %46 : vector<16x32xf32>
      %48 = arith.subf %40, %47 : vector<16x32xf32>
      %c0_33 = arith.constant 0 : index
      %c0_34 = arith.constant 0 : index
      %49 = vector.load %arg7[%c0_33, %c0_34] : memref<32x32xf32, #tpu.memory_space<vmem>>, vector<32x32xf32>
      %cst_35 = arith.constant dense<0.000000e+00> : vector<16x32xf32>
      %50 = tpu.matmul %48, %49, %cst_35 {dimension_numbers = #tpu.dot_dimension_numbers<[1], [0], [0], [1], [0, 0, 1, 1], [], []>} : vector<16x32xf32>, vector<32x32xf32>, vector<16x32xf32> -> vector<16x32xf32>
      %c0_36 = arith.constant 0 : index
      %c0_37 = arith.constant 0 : index
      %51 = vector.load %arg8[%c0_36, %c0_37] : memref<1x32xf32, #tpu.memory_space<vmem>>, vector<1x32xf32>
      %52 = vector.broadcast %51 : vector<1x32xf32> to vector<16x32xf32>
      %53 = arith.addf %50, %52 : vector<16x32xf32>
      %c0_38 = arith.constant 0 : index
      %c0_39 = arith.constant 0 : index
      %c0_40 = arith.constant 0 : index
      %54 = vector.load %arg9[%c0_38, %c0_39, %c0_40] : memref<1x16x32xf32, #tpu.memory_space<vmem>>, vector<1x16x32xf32>
      %55 = vector.shape_cast %54 : vector<1x16x32xf32> to vector<16x32xf32>
      %56 = vector.shape_cast %53 : vector<16x32xf32> to vector<1x16x32xf32>
      tpu.vector_store %arg9[%c0_38, %c0_39, %c0_40], %56 {strides = array<i32>} : memref<1x16x32xf32, #tpu.memory_space<vmem>>, vector<1x16x32xf32>,
      %cst_41 = arith.constant dense<0.000000e+00> : vector<32xf32>
      %57 = vector.multi_reduction <add>, %53, %cst_41 [0] : vector<16x32xf32> to vector<32xf32>
      %58 = vector.shape_cast %57 : vector<32xf32> to vector<1x32xf32>
      %c0_42 = arith.constant 0 : index
      %c0_43 = arith.constant 0 : index
      %c0_44 = arith.constant 0 : index
      %59 = vector.load %arg10[%c0_42, %c0_43, %c0_44] : memref<1x1x32xf32, #tpu.memory_space<vmem>>, vector<1x1x32xf32>
      %60 = vector.shape_cast %59 : vector<1x1x32xf32> to vector<1x32xf32>
      %61 = vector.shape_cast %58 : vector<1x32xf32> to vector<1x1x32xf32>
      tpu.vector_store %arg10[%c0_42, %c0_43, %c0_44], %61 {strides = array<i32>} : memref<1x1x32xf32, #tpu.memory_space<vmem>>, vector<1x1x32xf32>,
      %62 = arith.mulf %53, %53 : vector<16x32xf32>
      %cst_45 = arith.constant dense<0.000000e+00> : vector<32xf32>
      %63 = vector.multi_reduction <add>, %62, %cst_45 [0] : vector<16x32xf32> to vector<32xf32>
      %64 = vector.shape_cast %63 : vector<32xf32> to vector<1x32xf32>
      %c0_46 = arith.constant 0 : index
      %c0_47 = arith.constant 0 : index
      %c0_48 = arith.constant 0 : index
      %65 = vector.load %arg11[%c0_46, %c0_47, %c0_48] : memref<1x1x32xf32, #tpu.memory_space<vmem>>, vector<1x1x32xf32>
      %66 = vector.shape_cast %65 : vector<1x1x32xf32> to vector<1x32xf32>
      %67 = vector.shape_cast %64 : vector<1x32xf32> to vector<1x1x32xf32>
      tpu.vector_store %arg11[%c0_46, %c0_47, %c0_48], %67 {strides = array<i32>} : memref<1x1x32xf32, #tpu.memory_space<vmem>>, vector<1x1x32xf32>,
    } else {
    }
    return
  }
  func.func @transform_0(%arg0: i32, %arg1: i32) -> (i32, i32, i32) {
    %c0_i32 = arith.constant 0 : i32
    %c0_i32_0 = arith.constant 0 : i32
    %c0_i32_1 = arith.constant 0 : i32
    return %arg0, %c0_i32, %c0_i32_0 : i32, i32, i32
  }
  func.func @transform_1(%arg0: i32, %arg1: i32) -> (i32, i32) {
    %c0_i32 = arith.constant 0 : i32
    %c0_i32_0 = arith.constant 0 : i32
    %c0_i32_1 = arith.constant 0 : i32
    return %c0_i32, %c0_i32_0 : i32, i32
  }
  func.func @transform_2(%arg0: i32, %arg1: i32) -> (i32, i32) {
    %c0_i32 = arith.constant 0 : i32
    %c0_i32_0 = arith.constant 0 : i32
    %c0_i32_1 = arith.constant 0 : i32
    return %c0_i32, %c0_i32_0 : i32, i32
  }
  func.func @transform_3(%arg0: i32, %arg1: i32) -> (i32, i32) {
    %c0_i32 = arith.constant 0 : i32
    %c0_i32_0 = arith.constant 0 : i32
    %c0_i32_1 = arith.constant 0 : i32
    return %c0_i32, %c0_i32_0 : i32, i32
  }
  func.func @transform_4(%arg0: i32, %arg1: i32) -> (i32, i32) {
    %c0_i32 = arith.constant 0 : i32
    %c0_i32_0 = arith.constant 0 : i32
    %c0_i32_1 = arith.constant 0 : i32
    return %c0_i32, %c0_i32_0 : i32, i32
  }
  func.func @transform_5(%arg0: i32, %arg1: i32) -> (i32, i32) {
    %c0_i32 = arith.constant 0 : i32
    %c0_i32_0 = arith.constant 0 : i32
    %c0_i32_1 = arith.constant 0 : i32
    return %c0_i32, %c0_i32_0 : i32, i32
  }
  func.func @transform_6(%arg0: i32, %arg1: i32) -> (i32, i32) {
    %c0_i32 = arith.constant 0 : i32
    %c0_i32_0 = arith.constant 0 : i32
    %c0_i32_1 = arith.constant 0 : i32
    return %c0_i32, %c0_i32_0 : i32, i32
  }
  func.func @transform_7(%arg0: i32, %arg1: i32) -> (i32, i32, i32) {
    %c0_i32 = arith.constant 0 : i32
    %c0_i32_0 = arith.constant 0 : i32
    %c0_i32_1 = arith.constant 0 : i32
    return %arg0, %c0_i32, %c0_i32_0 : i32, i32, i32
  }
  func.func @transform_8(%arg0: i32, %arg1: i32) -> (i32, i32, i32) {
    %c0_i32 = arith.constant 0 : i32
    %c0_i32_0 = arith.constant 0 : i32
    %c0_i32_1 = arith.constant 0 : i32
    return %arg0, %c0_i32, %c0_i32_0 : i32, i32, i32
  }
  func.func @transform_9(%arg0: i32, %arg1: i32) -> (i32, i32, i32) {
    %c0_i32 = arith.constant 0 : i32
    %c0_i32_0 = arith.constant 0 : i32
    %c0_i32_1 = arith.constant 0 : i32
    return %arg0, %c0_i32, %c0_i32_0 : i32, i32, i32
  }
}

module attributes {stable_mosaic.version = 11 : i64} {
  func.func @bn_apply_kernel(%arg0: i32, %arg1: memref<1x32xf32, #tpu.memory_space<vmem>>, %arg2: memref<1x32xf32, #tpu.memory_space<vmem>>, %arg3: memref<8x32xf32, #tpu.memory_space<vmem>>, %arg4: memref<8x32xf32, #tpu.memory_space<vmem>>, %arg5: memref<1x32xf32, #tpu.memory_space<vmem>>, %arg6: memref<1x32xf32, #tpu.memory_space<vmem>>, %arg7: memref<8x32xf32, #tpu.memory_space<vmem>>) attributes {dimension_semantics = [#tpu.dimension_semantics<parallel>], iteration_bounds = array<i64: 4>, scalar_prefetch = 0 : i64, scratch_operands = 0 : i64, tpu.core_type = #tpu.core_type<tc>, window_params = [{pipeline_mode = #tpu.pipeline_mode<synchronous>, transform_indices = @transform_0, window_bounds = array<i64: 1, 32>}, {pipeline_mode = #tpu.pipeline_mode<synchronous>, transform_indices = @transform_1, window_bounds = array<i64: 1, 32>}, {transform_indices = @transform_2, window_bounds = array<i64: 8, 32>}, {transform_indices = @transform_3, window_bounds = array<i64: 8, 32>}, {pipeline_mode = #tpu.pipeline_mode<synchronous>, transform_indices = @transform_4, window_bounds = array<i64: 1, 32>}, {pipeline_mode = #tpu.pipeline_mode<synchronous>, transform_indices = @transform_5, window_bounds = array<i64: 1, 32>}, {transform_indices = @transform_6, window_bounds = array<i64: 8, 32>}]} {
    %c0 = arith.constant 0 : index
    %c0_0 = arith.constant 0 : index
    %0 = vector.load %arg1[%c0, %c0_0] : memref<1x32xf32, #tpu.memory_space<vmem>>, vector<1x32xf32>
    %cst = arith.constant 3.125000e-02 : f32
    %1 = vector.broadcast %cst : f32 to vector<1x32xf32>
    %2 = arith.mulf %0, %1 : vector<1x32xf32>
    %c0_1 = arith.constant 0 : index
    %c0_2 = arith.constant 0 : index
    %3 = vector.load %arg2[%c0_1, %c0_2] : memref<1x32xf32, #tpu.memory_space<vmem>>, vector<1x32xf32>
    %cst_3 = arith.constant 3.125000e-02 : f32
    %4 = vector.broadcast %cst_3 : f32 to vector<1x32xf32>
    %5 = arith.mulf %3, %4 : vector<1x32xf32>
    %6 = arith.mulf %2, %2 : vector<1x32xf32>
    %7 = arith.subf %5, %6 : vector<1x32xf32>
    %cst_4 = arith.constant 0.000000e+00 : f32
    %8 = vector.broadcast %cst_4 : f32 to vector<1x32xf32>
    %9 = arith.maximumf %7, %8 : vector<1x32xf32>
    %cst_5 = arith.constant 9.99999974E-6 : f32
    %10 = vector.broadcast %cst_5 : f32 to vector<1x32xf32>
    %11 = arith.addf %9, %10 : vector<1x32xf32>
    %12 = math.rsqrt %11 : vector<1x32xf32>
    %c0_6 = arith.constant 0 : index
    %c0_7 = arith.constant 0 : index
    %13 = vector.load %arg3[%c0_6, %c0_7] : memref<8x32xf32, #tpu.memory_space<vmem>>, vector<8x32xf32>
    %14 = vector.broadcast %2 : vector<1x32xf32> to vector<8x32xf32>
    %15 = arith.subf %13, %14 : vector<8x32xf32>
    %c0_8 = arith.constant 0 : index
    %c0_9 = arith.constant 0 : index
    %16 = vector.load %arg5[%c0_8, %c0_9] : memref<1x32xf32, #tpu.memory_space<vmem>>, vector<1x32xf32>
    %17 = arith.mulf %12, %16 : vector<1x32xf32>
    %18 = vector.broadcast %17 : vector<1x32xf32> to vector<8x32xf32>
    %19 = arith.mulf %15, %18 : vector<8x32xf32>
    %c0_10 = arith.constant 0 : index
    %c0_11 = arith.constant 0 : index
    %20 = vector.load %arg6[%c0_10, %c0_11] : memref<1x32xf32, #tpu.memory_space<vmem>>, vector<1x32xf32>
    %21 = vector.broadcast %20 : vector<1x32xf32> to vector<8x32xf32>
    %22 = arith.addf %19, %21 : vector<8x32xf32>
    %c0_12 = arith.constant 0 : index
    %c0_13 = arith.constant 0 : index
    %23 = vector.load %arg4[%c0_12, %c0_13] : memref<8x32xf32, #tpu.memory_space<vmem>>, vector<8x32xf32>
    %cst_14 = arith.constant 0.000000e+00 : f32
    %24 = vector.broadcast %cst_14 : f32 to vector<8x32xf32>
    %25 = arith.maximumf %22, %24 : vector<8x32xf32>
    %26 = arith.addf %23, %25 : vector<8x32xf32>
    %c0_15 = arith.constant 0 : index
    %c0_16 = arith.constant 0 : index
    %27 = vector.load %arg7[%c0_15, %c0_16] : memref<8x32xf32, #tpu.memory_space<vmem>>, vector<8x32xf32>
    tpu.vector_store %arg7[%c0_15, %c0_16], %26 {strides = array<i32>} : memref<8x32xf32, #tpu.memory_space<vmem>>, vector<8x32xf32>,
    return
  }
  func.func @transform_0(%arg0: i32) -> (i32, i32) {
    %c0_i32 = arith.constant 0 : i32
    %c0_i32_0 = arith.constant 0 : i32
    %c0_i32_1 = arith.constant 0 : i32
    return %c0_i32, %c0_i32_0 : i32, i32
  }
  func.func @transform_1(%arg0: i32) -> (i32, i32) {
    %c0_i32 = arith.constant 0 : i32
    %c0_i32_0 = arith.constant 0 : i32
    %c0_i32_1 = arith.constant 0 : i32
    return %c0_i32, %c0_i32_0 : i32, i32
  }
  func.func @transform_2(%arg0: i32) -> (i32, i32) {
    %c0_i32 = arith.constant 0 : i32
    %c0_i32_0 = arith.constant 0 : i32
    return %arg0, %c0_i32 : i32, i32
  }
  func.func @transform_3(%arg0: i32) -> (i32, i32) {
    %c0_i32 = arith.constant 0 : i32
    %c0_i32_0 = arith.constant 0 : i32
    return %arg0, %c0_i32 : i32, i32
  }
  func.func @transform_4(%arg0: i32) -> (i32, i32) {
    %c0_i32 = arith.constant 0 : i32
    %c0_i32_0 = arith.constant 0 : i32
    %c0_i32_1 = arith.constant 0 : i32
    return %c0_i32, %c0_i32_0 : i32, i32
  }
  func.func @transform_5(%arg0: i32) -> (i32, i32) {
    %c0_i32 = arith.constant 0 : i32
    %c0_i32_0 = arith.constant 0 : i32
    %c0_i32_1 = arith.constant 0 : i32
    return %c0_i32, %c0_i32_0 : i32, i32
  }
  func.func @transform_6(%arg0: i32) -> (i32, i32) {
    %c0_i32 = arith.constant 0 : i32
    %c0_i32_0 = arith.constant 0 : i32
    return %arg0, %c0_i32 : i32, i32
  }
}

</mosaic_0001>

<bundles_post_ra>
// kernel: sa_layer_single_head.3
= control target key start
LH: loop header
LB: loop body
LE: loop exit
PB: predicated region body
PF: predicated region fallthrough
CT: control target
= control target key end

     0   :  { %s432_s21 = smov 0   ;;  %s464_s0 = inlined_call_operand.vmem [shape: f32[1,32], index: 0, kind: input, shape index: {}]   ;;  %s465_s1 = inlined_call_operand.vmem [shape: f32[1,32], index: 1, kind: input, shape index: {}]   ;;  %s466_s2 = inlined_call_operand.vmem [shape: f32[32,32], index: 2, kind: input, shape index: {}, may-alias: {2,6}]   ;;  %s467_s3 = inlined_call_operand.vmem [shape: f32[32,32], index: 3, kind: input, shape index: {}]   ;;  %s468_s4 = inlined_call_operand.vmem [shape: f32[1,32], index: 4, kind: input, shape index: {}]   ;;  %s469_s5 = inlined_call_operand.vmem [shape: f32[1,32], index: 5, kind: input, shape index: {}]   ;;  %s470_s6 = inlined_call_operand.vmem [shape: f32[32,32], index: 6, kind: output, shape index: {}, may-alias: {2,6}]  }
   0x1 LB: > { %s368_s22 = sadd.s32 4294967295, %s395_s21   ;;  %p372_p0 = scmp.ge.s32.totalorder %s395_s21, 1  ;;  %s395_s21 = sphi %s432_s21, %s16_s21  }
   0x2   : > { %p220_p1 = scmp.lt.s32.totalorder %s395_s21, 5 }
   0x4   : > { %p221_p2 = pnand %p372_p0, %p220_p1 }
   0x5   : > { %v264_v0 = vld [vmem:[%s464_s0] sm:$0x1] (!%p221_p2)  ;;  %p252_p3 = scmp.lt.s32.totalorder (!%p221_p2), %s368_s22, 3  ;;  %v275_v6 = vlaneseq (!%p221_p2)  ;;  %vm301_vm0 = vcmask (!%p221_p2), 261120  }
   0x6   : > { %224 = sbr.rel (%p221_p2) target bundleno = 40 (0x28), region = 44  ;;  %v266_v1 = vld [vmem:[%s465_s1] sm:$0x1] (!%p221_p2)  ;;  %v265_v2 = vmul.f32 (!%p221_p2), 0.03125, %v264_v0 }
   0x7   : > { %v267_v3 = vmul.f32 (!%p221_p2), 0.03125, %v266_v1  ;;  %v276_v9 = vshrl.u32 (!%p221_p2), %v275_v6, 7  ;;  %v281_v13 = vld [vmem:[%s468_s4] sm:$0x1] (!%p221_p2) }
   0x8   : > { %v268_v4 = vmul.f32 (!%p221_p2), %v265_v2, %v265_v2  ;;  %v376_v18 = vld [vmem:[%s469_s5] ss:$0 sm:$0xff] (!%p221_p2) }
   0x9   : > { %v277_v10 = vsub.s32 (!%p221_p2), 0, %v276_v9 }
   0xa   : > { %v269_v5 = vsub.f32 (!%p221_p2), %v267_v3, %v268_v4 }
   0xb   : > { %v278_v11 = vrot.slane (!%p221_p2), %v265_v2, %v277_v10 }
   0xc   : > { %v270_v7 = vmax.f32 (!%p221_p2), %v269_v5, 0.0 }
   0xd   : > { %s472_s22 = smov (!%p252_p3, %s368_s22), 3 }
   0xe   : > { %v271_v8 = vadd.f32 1e-05, %v270_v7  ;;  %s373_s27 = sshll.u32 %s472_s22, 3 }
   0xf   : > { %s255_s30 = scalar_lea.vmem %s466_s2, %s373_s27  ;;  %s259_s13 = scalar_lea.vmem %s467_s3, %s373_s27 }
  0x10   : > { %387 = vrsqrt.f32 %v271_v8  ;;  %v273_v12 = vld [vmem:[%s255_s30] sm:$0xff]  ;;  %s263_s16 = scalar_lea.vmem %s470_s6, %s373_s27 }
  0x11   : > { %v280_v15 = vsub.f32 %v273_v12, %v278_v11  ;;  %v298_v21 = vld [vmem:[%s259_s13] sm:$0xff] }
  0x1a   : > { %v388_v14 = vpop.eup %387 }
  0x1b   : > { %v282_v16 = vmul.f32 %v388_v14, %v281_v13 }
  0x1d   : > { %v287_v17 = vrot.slane %v282_v16, %v277_v10 }
  0x1f   : > { %v289_v19 = vmul.f32 %v287_v17, %v280_v15 }
  0x21   : > { %v297_v20 = vadd.f32 %v376_v18, %v289_v19 }
  0x23   : > { %v299_v22 = vmax.f32 %v297_v20, 0.0 }
  0x25   : > { %v300_v23 = vadd.f32 %v299_v22, %v298_v21 }
  0x27   : > { %302 = vst.msk [vmem:[%s263_s16] sm:$0xff] %vm301_vm0, %v300_v23 }
  0x28 PF: > { %s16_s21 = sadd.s32 1, %s395_s21  }
  0x29   : > { %p13_p4 = scmp.ge.s32.totalorder %s16_s21, 6  }
  0x2b   :  { %15 = sbr.rel (!%p13_p4) target bundleno = 1 (0x1), region = 77 }

// kernel: sa_layer_single_head.2
= control target key start
LH: loop header
LB: loop body
LE: loop exit
PB: predicated region body
PF: predicated region fallthrough
CT: control target
= control target key end

     0   :  { %s1391_s30 = smov 0   ;;  %s1393_s10 = smov 0   ;;  %s1561_s0 = inlined_call_operand.vmem [shape: f32[2,16,32], index: 0, kind: input, shape index: {}]   ;;  %s1562_s1 = inlined_call_operand.vmem [shape: f32[32,8], index: 1, kind: input, shape index: {}]   ;;  %s1563_s2 = inlined_call_operand.vmem [shape: f32[32,8], index: 2, kind: input, shape index: {}]   ;;  %s1564_s3 = inlined_call_operand.vmem [shape: f32[32,32], index: 3, kind: input, shape index: {}]   ;;  %s1565_s4 = inlined_call_operand.vmem [shape: f32[1,32], index: 4, kind: input, shape index: {}]   ;;  %s1566_s5 = inlined_call_operand.vmem [shape: f32[32,32], index: 5, kind: input, shape index: {}]   ;;  %s1567_s6 = inlined_call_operand.vmem [shape: f32[1,32], index: 6, kind: input, shape index: {}]   ;;  %s1568_s7 = inlined_call_operand.vmem [shape: f32[2,16,32], index: 7, kind: output, shape index: {0}]   ;;  %s1569_s8 = inlined_call_operand.vmem [shape: f32[2,1,32], index: 8, kind: output, shape index: {1}]   ;;  %s1570_s9 = inlined_call_operand.vmem [shape: f32[2,1,32], index: 9, kind: output, shape index: {2}]  }
   0x1   :  { %s1395_s11 = smov 0   ;;  %s1397_s12 = smov 0  }
   0x2   :  { %s1399_s13 = smov 0  }
   0x3 LB: > { %s29_s14 = sadd.s32 1, %s1326_s11  ;;  %s32_s15 = sadd.s32 1, %s1330_s12  ;;  %s1334_s13 = sphi %s1399_s13, %s20_s13   ;;  %s1330_s12 = sphi %s1397_s12, %s1574_s12   ;;  %s1326_s11 = sphi %s1395_s11, %s1573_s11   ;;  %s1322_s10 = sphi %s1393_s10, %s1572_s10   ;;  %s1318_s30 = sphi %s1391_s30, %s1571_s30  }
   0x4   : > { %p30_p0 = scmp.ge.s32.totalorder %s29_s14, 2  ;;  %p1105_p1 = scmp.ge.s32.totalorder %s1334_s13, 1 }
   0x5   : > { %p304_p2 = scmp.lt.s32.totalorder %s1334_s13, 5 }
   0x6   : > { %s1576_s14 = smov (%p30_p0, %s29_s14), 0  ;;  %s1578_s15 = smov (!%p30_p0, %s32_s15), %s1330_s12 }
   0x7   : > { %p305_p3 = pnand %p1105_p1, %p304_p2  ;;  %p34_p4 = scmp.ge.s32.totalorder %s1578_s15, 2 }
   0x8   : > { %p346_p5 = scmp.lt.s32.totalorder (!%p305_p3), %s1322_s10, 1  ;;  %p1110_p6 = scmp.ne.s32.totalorder (!%p305_p3), %s1318_s30, 0 }
   0x9   : > { %s1580_s15 = smov (%p34_p4, %s1578_s15), 0  ;;  %308 = sbr.rel (%p305_p3) target bundleno = 1275 (0x4fb), region = 48 }
  0x10   : > { %s1582_s10 = smov (!%p346_p5, %s1322_s10), 1  ;;  %365 = sbr.rel (%p1110_p6) target bundleno = 242 (0xf2), region = 52 }
  0x11   : > { %s1128_s16 = sshll.u32 %s1582_s10, 4  ;;  %s358_s19 = scalar_lea.vmem %s1569_s8, %s1582_s10  ;;  %v368_v0 = vld [vmem:[%s1563_s2] sm:$0xff] (!%p1110_p6)  ;;  %v369_v1 = vld [vmem:[%s1563_s2 + $0x8] sm:$0xff] (!%p1110_p6)  ;;  %v370_v2 = vld [vmem:[%s1563_s2 + $0x10] sm:$0xff] (!%p1110_p6)  ;;  %vm372_vm0 = vcmask (!%p1110_p6), 261120   ;;  %vm459_vm1 = vcmask (!%p1110_p6), 7168  }
  0x12   : > { %s1433_s22 = scalar_lea.vmem %s1561_s0, %s1128_s16  ;;  %s1438_s25 = scalar_lea.vmem %s1568_s7, %s1128_s16  ;;  %v1212_v3 = vpack.c.bf16 (!%p1110_p6), %v369_v1, %v368_v0  ;;  %v371_v4 = vld [vmem:[%s1563_s2 + $0x18] sm:$0xff] (!%p1110_p6)  ;;  %v1336_v6 = vmov (!%p1110_p6), 0.0   ;;  %vm454_vm2 = vcmask (!%p1110_p6), 64512  }
  0x13   : > { %s361_s28 = scalar_lea.vmem %s1570_s9, %s1582_s10  ;;  %v366_v5 = vld [vmem:[%s1433_s22] sm:$0xff] (!%p1110_p6)  ;;  %457 = vst.msk [vmem:[#allocation3] sm:$0xff] (!%p1110_p6), %vm372_vm0, %v1336_v6  ;;  %458 = vst.msk [vmem:[#allocation3 + $0x8] sm:$0xff] (!%p1110_p6), %vm372_vm0, %v1336_v6  ;;  %v1216_v7 = vpack.c.bf16 (!%p1110_p6), %v371_v4, %v370_v2  ;;  %v367_v8 = vld [vmem:[%s1433_s22 + $0x8] sm:$0xff] (!%p1110_p6) }
  0x14   : > { %460 = vst.msk [vmem:[#allocation4] sm:$0xff] (!%p1110_p6), %vm459_vm1, %v1336_v6  ;;  %461 = vst.msk [vmem:[#allocation4 + $0x8] sm:$0xff] (!%p1110_p6), %vm459_vm1, %v1336_v6  ;;  %1166 = vmatprep.mubr.msk.f32.mxu0 (!%p1110_p6), %vm372_vm0, %v366_v5  ;;  %1213 = vmatprep.subr.bf16.mxu0 (!%p1110_p6), %v1212_v3 }
  0x15   : > { %1215 = vmatpush3.bf16.msra.mxu0 (!%p1110_p6), %v1212_v3 }
  0x16   : > { %1217 = vmatprep.subr.bf16.mxu0 (!%p1110_p6), %v1216_v7 }
  0x19   : > { %1219 = vmatpush3.bf16.msra.mxu0 %v1216_v7 }
  0x1c   : > { %1167 = vmatmul.mubr.msk.f32.vlgmr.msra.gmra.mrb[0].mxu0 %vm372_vm0, %v367_v8 }
  0xef   : > { %v1168_v9 = vpop.f32.mrb[0].mxu0 }
  0xf0   : > { %456 = vst.msk [vmem:[#allocation2 + $0x8] sm:$0xff] %vm454_vm2, %v1168_v9  ;;  %v445_v10 = vpop.f32.mrb[1].mxu0 }
  0xf1   : > { %455 = vst.msk [vmem:[#allocation2] sm:$0xff] %vm454_vm2, %v445_v10 }
  0xf2 PF: > { %v465_v11 = vld [vmem:[%s1562_s1] sm:$0xff]  ;;  %v466_v12 = vld [vmem:[%s1562_s1 + $0x8] sm:$0xff]  ;;  %v467_v13 = vld [vmem:[%s1562_s1 + $0x10] sm:$0xff]  ;;  %v1337_v14 = vmov 0.0|0.0   ;;  %vm1338_vm3 = vmmov 0   ;;  %v1339_v17 = vmov 0.0  }
  0xf3   : > { %1220 = vmatprep.subr.bf16.mxu0 %v1337_v14  ;;  %v1221_v15 = vpack.c.bf16 %v466_v12, %v465_v11  ;;  %v468_v16 = vld [vmem:[%s1562_s1 + $0x18] sm:$0xff]  ;;  %1177 = vmatprep.mubr.msk.f32.mxu0 %vm1338_vm3, %v1339_v17  ;;  %s1113_s16 = sshll.u32 %s1318_s30, 3  ;;  %vm469_vm4 = vcmask 261120   ;;  %vm626_vm5 = vcmask 64512   ;;  %v543_v21 = vld [vmem:[%s1564_s3] sm:$0xff]  ;;  %v544_v22 = vld [vmem:[%s1564_s3 + $0x8] sm:$0xff] }
  0xf4   : > { %1226 = vmatprep.subr.bf16.mxu1 %v1337_v14  ;;  %1188 = vmatprep.mubr.msk.f32.mxu1 %vm1338_vm3, %v1339_v17  ;;  %v1224_v18 = vpack.c.bf16 %v468_v16, %v467_v13  ;;  %s463_s24 = scalar_lea.vmem %s1433_s22, %s1113_s16  ;;  %v545_v23 = vld [vmem:[%s1564_s3 + $0x10] sm:$0xff]  ;;  %v1227_v24 = vpack.c.bf16 %v544_v22, %v543_v21  ;;  %v546_v25 = vld [vmem:[%s1564_s3 + $0x18] sm:$0xff]  ;;  %v1115_v30 = vld [vmem:[%s1565_s4] ss:$0 sm:$0xff]  ;;  %vm748_vm6 = vcmask 7168   ;;  %p1122_p7 = scmp.ne.s32.totalorder %s1318_s30, 1 }
  0xf5   : > { %1222 = vmatpush3.bf16.msra.mxu0 %v1221_v15  ;;  %v464_v19 = vld [vmem:[%s463_s24] sm:$0xff]  ;;  %v1230_v26 = vpack.c.bf16 %v546_v25, %v545_v23  ;;  %v752_v7 = vld [vmem:[#allocation3 + $0x8] sm:$0xff]  ;;  %v751_v8 = vld [vmem:[#allocation3] sm:$0xff]  ;;  %v1340_v15 = vmov (!%p1122_p7), 0   ;;  %vm969_vm7 = vcmask (!%p1122_p7), 253952  }
  0xf6   : > { %1223 = vmatprep.subr.bf16.mxu0 %v1337_v14  ;;  %1228 = vmatpush3.bf16.msra.mxu1 %v1227_v24  ;;  %v738_v1 = vld [vmem:[#allocation4] sm:$0xff]  ;;  %v739_v4 = vld [vmem:[#allocation4 + $0x8] sm:$0xff]  ;;  %v868_v23 = vld [vmem:[%s1566_s5 + $0x10] sm:$0xff] (!%p1122_p7) }
  0xf7   : > { %1229 = vmatprep.subr.bf16.mxu1 %v1337_v14  ;;  %v625_v29 = vld [vmem:[#allocation2 + $0x8] sm:$0xff]  ;;  %1291 = vset.pattern.permute.xlu0 (!%p1122_p7), %v1340_v15  ;;  %v869_v24 = vld [vmem:[%s1566_s5 + $0x18] sm:$0xff] (!%p1122_p7) }
  0xf8   : > { %v624_v20 = vld [vmem:[#allocation2] sm:$0xff]  ;;  %v1236_v25 = vpack.c.bf16 (!%p1122_p7), %v869_v24, %v868_v23 }
  0xf9   : > { %1225 = vmatpush3.bf16.msra.mxu0 %v1224_v18  ;;  %v866_v18 = vld [vmem:[%s1566_s5] sm:$0xff] (!%p1122_p7) }
  0xfa   : > { %1231 = vmatpush3.bf16.msra.mxu1 %v1230_v26 }
  0xfc   : > { %1178 = vmatmul.mubr.msk.f32.vlgmr.msra.gmra.mrb[0].mxu0 %vm469_vm4, %v464_v19 }
  0xfd   : > { %1193 = vmatprep.mubr.msk.f32.mxu0 %vm626_vm5, %v624_v20  ;;  %1189 = vmatmul.mubr.msk.f32.vlgmr.msra.gmra.mrb[0].mxu1 %vm469_vm4, %v464_v19  ;;  %v867_v19 = vld [vmem:[%s1566_s5 + $0x8] sm:$0xff] (!%p1122_p7) }
  0xfe   : > { %v1232_v20 = vpack.c.bf16 (!%p1122_p7), %v867_v19, %v866_v18 }
 0x1cf   : > { %v539_v27 = vpop.f32.mrb[0].mxu0 }
 0x1d0   : > { %v1179_v28 = vpop.f32.mrb[1].mxu0  ;;  %1191 = vmatprep.subr.msk.mxu0 %vm626_vm5, %v539_v27  ;;  %v620_v31 = vpop.f32.mrb[0].mxu1 }
 0x1d1   : > { %1192 = vmatpush3.xpose.msk.msra.mxu0 %vm626_vm5, %v539_v27  ;;  %v621_v32 = vadd.f32 %v1115_v30, %v620_v31  ;;  %v1190_v33 = vpop.f32.mrb[1].mxu1  ;;  %v842_v28 = vld [vmem:[%s1433_s22] sm:$0xff] (!%p1122_p7) }
 0x1d2   : > { %1233 = vmatprep.subr.bf16.mxu0 (!%p1122_p7), %v1232_v20  ;;  %v843_v33 = vld [vmem:[%s1433_s22 + $0x8] sm:$0xff] (!%p1122_p7) }
 0x1d3   : > { %1196 = vmatprep.subr.mxu1 %v621_v32 }
 0x1d4   : > { %1194 = vmatmul.mubr.msk.f32.vlgmr.msra.gmra.mrb[2].mxu0 %vm626_vm5, %v625_v29  ;;  %1197 = vmatpush3.msra.mxu1 %v621_v32 }
 0x1d5   : > { %1235 = vmatpush3.bf16.msra.mxu0 (!%p1122_p7), %v1232_v20 }
 0x1d6   : > { %1237 = vmatprep.subr.bf16.mxu0 (!%p1122_p7), %v1236_v25 }
 0x1d9   : > { %1239 = vmatpush3.bf16.msra.mxu0 (!%p1122_p7), %v1236_v25 }
 0x2a7   : > { %v1195_v34 = vpop.f32.mrb[2].mxu0 }
 0x2a8   : > { %v712_v35 = vsel %vm626_vm5, %v1195_v34, -inf  ;;  %v702_v36 = vpop.f32.mrb[3].mxu0 }
 0x2a9   : > { %v711_v37 = vsel %vm626_vm5, %v702_v36, -inf }
 0x2aa   : > { %v713_v38 = vmax.f32 %v711_v37, %v712_v35 }
 0x2ac   : > { %v714_v39 = vrot.slane %v713_v38, 4 }
 0x2ae   : > { %v715_v40 = vmax.f32 %v713_v38, %v714_v39 }
 0x2b0   : > { %v716_v41 = vrot.slane %v715_v40, 2 }
 0x2b2   : > { %v717_v42 = vmax.f32 %v715_v40, %v716_v41 }
 0x2b4   : > { %v718_v43 = vrot.slane %v717_v42, 1 }
 0x2b6   : > { %v719_v44 = vmax.f32 %v717_v42, %v718_v43 }
 0x2b8   : > { %v720_v45 = vsub.f32 %v702_v36, %v719_v44  ;;  %v721_v46 = vsub.f32 %v1195_v34, %v719_v44  ;;  %v1123_v36 = vld [vmem:[%s1567_s6] ss:$0 sm:$0xff] (!%p1122_p7) }
 0x2ba   : > { %v722_v47 = vmul.f32 1.442695, %v720_v45  ;;  %v724_v48 = vmul.f32 1.442695, %v721_v46 }
 0x2bc   : > { %1285 = vpow2.f32 %v722_v47 }
 0x2bd   : > { %1287 = vpow2.f32 %v724_v48 }
 0x2c6   : > { %v1286_v49 = vpop.eup %1285 }
 0x2c7   : > { %v1288_v50 = vpop.eup %1287  ;;  %v726_v51 = vsel %vm626_vm5, %v1286_v49, 0.0 }
 0x2c8   : > { %v727_v52 = vsel %vm626_vm5, %v1288_v50, 0.0 }
 0x2c9   : > { %v728_v53 = vadd.f32 %v727_v52, %v726_v51 }
 0x2cb   : > { %v729_v54 = vrot.slane %v728_v53, 4 }
 0x2cd   : > { %v730_v55 = vadd.f32 %v729_v54, %v728_v53 }
 0x2cf   : > { %v731_v56 = vrot.slane %v730_v55, 2 }
 0x2d1   : > { %v732_v57 = vadd.f32 %v731_v56, %v730_v55 }
 0x2d3   : > { %v733_v58 = vrot.slane %v732_v57, 1 }
 0x2d5   : > { %v734_v59 = vadd.f32 %v733_v58, %v732_v57 }
 0x2d7   : > { %1289 = vrcp.f32 %v734_v59 }
 0x2e1   : > { %v1290_v60 = vpop.eup %1289 }
 0x2e2   : > { %v736_v61 = vmul.f32 %v1290_v60, %v1286_v49  ;;  %v737_v62 = vmul.f32 %v1290_v60, %v1288_v50 }
 0x2e4   : > { %1198 = vmatprep.mubr.msk.f32.mxu1 %vm626_vm5, %v736_v61  ;;  %v740_v63 = vsel %vm626_vm5, %v736_v61, 0.0  ;;  %v743_v0 = vsel %vm626_vm5, %v737_v62, 0.0 }
 0x2e5   : > { %1199 = vmatmul.mubr.msk.f32.vlgmr.msra.gmra.mrb[2].mxu1 %vm626_vm5, %v737_v62  ;;  %741 = vadd.xlane.f32.xlu0 %v740_v63 }
 0x2e9   : > { %744 = vadd.xlane.f32.xlu0 %v743_v0 }
 0x372   : > { %v742_v2 = vpop.xlane.xlu0 %741 }
 0x373   : > { %v746_v3 = vadd.f32 %v742_v2, %v738_v1 }
 0x375   : > { %749 = vst.msk [vmem:[#allocation4] sm:$0xff] %vm748_vm6, %v746_v3 }
 0x376   : > { %v745_v5 = vpop.xlane.xlu0 %744 }
 0x377   : > { %v747_v6 = vadd.f32 %v745_v5, %v739_v4 }
 0x379   : > { %750 = vst.msk [vmem:[#allocation4 + $0x8] sm:$0xff] %vm748_vm6, %v747_v6 }
 0x37c   : > { %v846_v13 = vld [vmem:[#allocation4] sm:$0xff] (!%p1122_p7) }
 0x37d   : > { %v848_v16 = vadd.f32 (!%p1122_p7), 1e-06, %v846_v13 }
 0x37f   : > { %1292 = vrcp.f32 (!%p1122_p7), %v848_v16 }
 0x380   : > { %v847_v14 = vld [vmem:[#allocation4 + $0x8] sm:$0xff] (!%p1122_p7) }
 0x381   : > { %v849_v17 = vadd.f32 (!%p1122_p7), 1e-06, %v847_v14 }
 0x383   : > { %1294 = vrcp.f32 (!%p1122_p7), %v849_v17 }
 0x389   : > { %v1293_v21 = vpop.eup (!%p1122_p7), %1292 }
 0x38a   : > { %854 = vperm.xlu0 (!%p1122_p7), %1291, %v1293_v21  }
 0x38d   : > { %v1295_v22 = vpop.eup (!%p1122_p7), %1294 }
 0x38e   : > { %859 = vperm.xlu0 (!%p1122_p7), %1291, %v1295_v22  }
 0x3b6   : > { %841 = sbr.rel (%p1122_p7) target bundleno = 1275 (0x4fb), region = 56 }
 0x3b8   : > { %v1200_v9 = vpop.f32.mrb[2].mxu1 }
 0x3b9   : > { %v835_v10 = vadd.f32 %v1200_v9, %v752_v7  ;;  %v825_v11 = vpop.f32.mrb[3].mxu1 }
 0x3ba   : > { %v834_v12 = vadd.f32 %v825_v11, %v751_v8 }
 0x3bb   : > { %837 = vst.msk [vmem:[#allocation3 + $0x8] sm:$0xff] %vm469_vm4, %v835_v10 }
 0x3bc   : > { %836 = vst.msk [vmem:[#allocation3] sm:$0xff] %vm469_vm4, %v834_v12 }
 0x3c2   : > { %v845_v30 = vld [vmem:[#allocation3 + $0x8] sm:$0xff] }
 0x3c3   : > { %v844_v26 = vld [vmem:[#allocation3] sm:$0xff] }
 0x409   : > { %v855_v27 = vpop.permute.xlu0 %854 }
 0x40a   : > { %v862_v29 = vmul.f32 %v855_v27, %v844_v26 }
 0x40c   : > { %v864_v31 = vsub.f32 %v842_v28, %v862_v29 }
 0x40d   : > { %v860_v32 = vpop.permute.xlu0 %859 }
 0x40e   : > { %v863_v34 = vmul.f32 %v860_v32, %v845_v30  ;;  %1209 = vmatprep.mubr.msk.f32.mxu0 %vm469_vm4, %v864_v31 }
 0x410   : > { %v865_v35 = vsub.f32 %v843_v33, %v863_v34 }
 0x412   : > { %1210 = vmatmul.mubr.msk.f32.vlgmr.msra.gmra.mrb[0].mxu0 %vm469_vm4, %v865_v35 }
 0x4e5   : > { %v1211_v37 = vpop.f32.mrb[0].mxu0 }
 0x4e6   : > { %v955_v38 = vadd.f32 %v1211_v37, %v1123_v36  ;;  %v949_v39 = vpop.f32.mrb[1].mxu0 }
 0x4e7   : > { %v950_v40 = vadd.f32 %v1123_v36, %v949_v39 }
 0x4e8   : > { %959 = vst.msk [vmem:[%s1438_s25 + $0x8] sm:$0xff] %vm469_vm4, %v955_v38  ;;  %v961_v41 = vsel %vm469_vm4, %v955_v38, 0.0  ;;  %v972_v42 = vmul.f32 %v955_v38, %v955_v38 }
 0x4e9   : > { %958 = vst.msk [vmem:[%s1438_s25] sm:$0xff] %vm469_vm4, %v950_v40  ;;  %v960_v43 = vsel %vm469_vm4, %v950_v40, 0.0  ;;  %v971_v44 = vmul.f32 %v950_v40, %v950_v40 }
 0x4ea   : > { %v974_v45 = vsel %vm469_vm4, %v972_v42, 0.0  ;;  %v962_v46 = vadd.f32 %v961_v41, %v960_v43 }
 0x4eb   : > { %v973_v47 = vsel %vm469_vm4, %v971_v44, 0.0 }
 0x4ec   : > { %v963_v48 = vrot.slane %v962_v46, 4  ;;  %v975_v49 = vadd.f32 %v974_v45, %v973_v47 }
 0x4ee   : > { %v964_v50 = vadd.f32 %v963_v48, %v962_v46  ;;  %v976_v51 = vrot.slane %v975_v49, 4 }
 0x4f0   : > { %v965_v52 = vrot.slane %v964_v50, 2  ;;  %v977_v53 = vadd.f32 %v976_v51, %v975_v49 }
 0x4f2   : > { %v966_v54 = vadd.f32 %v965_v52, %v964_v50  ;;  %v978_v55 = vrot.slane %v977_v53, 2 }
 0x4f4   : > { %v967_v56 = vrot.slane %v966_v54, 1  ;;  %v979_v57 = vadd.f32 %v978_v55, %v977_v53 }
 0x4f6   : > { %v968_v58 = vadd.f32 %v967_v56, %v966_v54  ;;  %v980_v59 = vrot.slane %v979_v57, 1 }
 0x4f8   : > { %970 = vst.msk [vmem:[%s358_s19] sm:$0x1] %vm969_vm7, %v968_v58  ;;  %v981_v60 = vadd.f32 %v980_v59, %v979_v57 }
 0x4fa   : > { %982 = vst.msk [vmem:[%s361_s28] sm:$0x1] %vm969_vm7, %v981_v60 }
 0x4fb PF: > { %s20_s13 = sadd.s32 1, %s1334_s13   ;;  %s1571_s30 = smov %s1326_s11 }
 0x4fc   : > { %p17_p8 = scmp.ge.s32.totalorder %s20_s13, 6   ;;  %s1572_s10 = smov %s1330_s12 }
 0x4fd   : > { %s1573_s11 = smov %s1576_s14  ;;  %s1574_s12 = smov %s1580_s15 }
 0x4fe   :  { %19 = sbr.rel (!%p17_p8) target bundleno = 3 (0x3), region = 111 }

</bundles_post_ra>
